<compile_context>
chip_gen: v7x
topology: tpu7x:2x2x1
jax: 0.10.0
libtpu: 0.0.40
codegen_flags: <defaults>
</compile_context>

<pallas_src>
import functools
import math

import jax
import jax.numpy as jnp
from jax.experimental import pallas as pl
from jax.experimental.pallas import tpu as pltpu


def _estimator_fused_kernel(x_ref, bn_scale_ref, bn_shift_ref, *rest,
                            num_linears: int):
    """rest = (wt_0, b_0, wt_1, b_1, ..., wt_{L-1}, b_{L-1}, o_ref)."""
    o_ref = rest[-1]
    params = rest[:-1]

    # Flattened input tile [TB, D]; BatchNorm1d folded into one fma.
    h = x_ref[...].astype(jnp.float32)
    h = h * bn_scale_ref[...] + bn_shift_ref[...]

    # Fused MLP: weights resident in VMEM, activations never leave the chip.
    for i in range(num_linears):
        wt = params[2 * i][...]            # [D_in, D_out] (pre-transposed)
        b = params[2 * i + 1][...]         # [1, D_out]
        h = jnp.dot(h, wt, preferred_element_type=jnp.float32) + b   # MXU
        if i < num_linears - 1:
            h = jnp.tanh(h)                # EUP; final layer: no activation
    o_ref[...] = h.astype(o_ref.dtype)


def estimator_forward(x, bn_scale, bn_shift, weights_t, biases, *, block_b=128):
    """Forward pass of EstimatorNetwork.

    x:         [B, *state_shape]
    bn_scale:  [1, D]   (gamma / sqrt(running_var + eps))
    bn_shift:  [1, D]   (beta  - running_mean * bn_scale)
    weights_t: list of [D_in, D_out] (already transposed)
    biases:    list of [1, D_out]
    """
    B = x.shape[0]
    x2 = x.reshape(B, -1)                  # nn.Flatten (free reshape)
    D = x2.shape[1]
    num_linears = len(weights_t)
    A = weights_t[-1].shape[1]

    # Batch tiling: 128-row tiles when divisible, otherwise one full block.
    tb = block_b if (B % block_b == 0) else B
    grid = (B // tb,)

    in_specs = [
        pl.BlockSpec((tb, D), lambda i: (i, 0)),   # x tile, marches with grid
        pl.BlockSpec((1, D), lambda i: (0, 0)),    # BN scale (resident)
        pl.BlockSpec((1, D), lambda i: (0, 0)),    # BN shift (resident)
    ]
    flat_params = []
    for wt, b in zip(weights_t, biases):
        in_specs.append(pl.BlockSpec(wt.shape, lambda i: (0, 0)))  # resident
        in_specs.append(pl.BlockSpec(b.shape, lambda i: (0, 0)))   # resident
        flat_params += [wt, b]

    kernel = functools.partial(_estimator_fused_kernel,
                               num_linears=num_linears)

    return pl.pallas_call(
        kernel,
        out_shape=jax.ShapeDtypeStruct((B, A), x.dtype),
        grid=grid,
        in_specs=in_specs,
        out_specs=pl.BlockSpec((tb, A), lambda i: (i, 0)),
        compiler_params=pltpu.CompilerParams(
            dimension_semantics=("parallel",)),   # shard batch across TCs (v7x)
    )(x2, bn_scale, bn_shift, *flat_params)


def init_estimator_params(key, state_shape, mlp_layers, num_actions,
                          *, bn_eps=1e-5):
    """Deterministic params.

    Linear: PyTorch default U(-1/sqrt(fan_in), 1/sqrt(fan_in)); weights are
    created directly in [in, out] layout (pre-transposed for the kernel).
    BatchNorm1d: random-but-deterministic gamma/beta/running stats (eval mode),
    folded into a single (scale, shift) pair at init time.
    """
    D = int(math.prod(state_shape))
    layer_dims = [D] + list(mlp_layers) + [num_actions]

    weights_t, biases = [], []
    for din, dout in zip(layer_dims[:-1], layer_dims[1:]):
        key, kw, kb = jax.random.split(key, 3)
        bound = 1.0 / math.sqrt(din)
        weights_t.append(jax.random.uniform(
            kw, (din, dout), jnp.float32, -bound, bound))
        biases.append(jax.random.uniform(
            kb, (1, dout), jnp.float32, -bound, bound))

    key, kg, kb2, km, kv = jax.random.split(key, 5)
    gamma = jax.random.uniform(kg, (1, D), jnp.float32, 0.5, 1.5)
    beta = 0.1 * jax.random.normal(kb2, (1, D), jnp.float32)
    running_mean = 0.1 * jax.random.normal(km, (1, D), jnp.float32)
    running_var = jax.random.uniform(kv, (1, D), jnp.float32, 0.5, 1.5)

    bn_scale = gamma * jax.lax.rsqrt(running_var + bn_eps)
    bn_shift = beta - running_mean * bn_scale
    return bn_scale, bn_shift, weights_t, biases


if __name__ == "__main__":
    key = jax.random.PRNGKey(0)
    k_x, k_p = jax.random.split(key)

    # Small but MXU/lane-friendly demo shapes:
    #   state_shape=(4, 32) -> D=128 (lane-dense), hidden=[128, 128], actions=2
    #   batch=256 -> grid=(2,) of 128-row tiles ("parallel" over TCs).
    batch = 256
    state_shape = (4, 32)
    mlp_layers = [128, 128]
    num_actions = 2

    x = jax.random.normal(k_x, (batch,) + state_shape, dtype=jnp.float32)
    bn_scale, bn_shift, weights_t, biases = init_estimator_params(
        k_p, state_shape, mlp_layers, num_actions)

    out = estimator_forward(x, bn_scale, bn_shift, weights_t, biases)
    out = jax.block_until_ready(out)

    # Plain-JAX reference with the same (eval-mode BN) semantics.
    ref = x.reshape(batch, -1) * bn_scale + bn_shift
    for i, (wt, b) in enumerate(zip(weights_t, biases)):
        ref = jnp.dot(ref, wt, precision=jax.lax.Precision.HIGHEST) + b
        if i < len(weights_t) - 1:
            ref = jnp.tanh(ref)

    assert out.shape == (batch, num_actions), out.shape
    assert jnp.allclose(out, ref, atol=1e-3, rtol=1e-3), "mismatch vs reference"

    print("KERNEL_OK")
</pallas_src>

<mosaic_0001>
module attributes {stable_mosaic.version = 11 : i64} {
  func.func @_estimator_fused_kernel(%arg0: i32, %arg1: memref<128x128xf32, #tpu.memory_space<vmem>>, %arg2: memref<1x128xf32, #tpu.memory_space<vmem>>, %arg3: memref<1x128xf32, #tpu.memory_space<vmem>>, %arg4: memref<128x128xf32, #tpu.memory_space<vmem>>, %arg5: memref<1x128xf32, #tpu.memory_space<vmem>>, %arg6: memref<128x128xf32, #tpu.memory_space<vmem>>, %arg7: memref<1x128xf32, #tpu.memory_space<vmem>>, %arg8: memref<128x2xf32, #tpu.memory_space<vmem>>, %arg9: memref<1x2xf32, #tpu.memory_space<vmem>>, %arg10: memref<128x2xf32, #tpu.memory_space<vmem>>) attributes {dimension_semantics = [#tpu.dimension_semantics<parallel>], iteration_bounds = array<i64: 2>, scalar_prefetch = 0 : i64, scratch_operands = 0 : i64, tpu.core_type = #tpu.core_type<tc>, window_params = [{transform_indices = @transform_0, window_bounds = array<i64: 128, 128>}, {pipeline_mode = #tpu.pipeline_mode<synchronous>, transform_indices = @transform_1, window_bounds = array<i64: 1, 128>}, {pipeline_mode = #tpu.pipeline_mode<synchronous>, transform_indices = @transform_2, window_bounds = array<i64: 1, 128>}, {pipeline_mode = #tpu.pipeline_mode<synchronous>, transform_indices = @transform_3, window_bounds = array<i64: 128, 128>}, {pipeline_mode = #tpu.pipeline_mode<synchronous>, transform_indices = @transform_4, window_bounds = array<i64: 1, 128>}, {pipeline_mode = #tpu.pipeline_mode<synchronous>, transform_indices = @transform_5, window_bounds = array<i64: 128, 128>}, {pipeline_mode = #tpu.pipeline_mode<synchronous>, transform_indices = @transform_6, window_bounds = array<i64: 1, 128>}, {pipeline_mode = #tpu.pipeline_mode<synchronous>, transform_indices = @transform_7, window_bounds = array<i64: 128, 2>}, {pipeline_mode = #tpu.pipeline_mode<synchronous>, transform_indices = @transform_8, window_bounds = array<i64: 1, 2>}, {transform_indices = @transform_9, window_bounds = array<i64: 128, 2>}]} {
    %c0 = arith.constant 0 : index
    %c0_0 = arith.constant 0 : index
    %0 = vector.load %arg1[%c0, %c0_0] : memref<128x128xf32, #tpu.memory_space<vmem>>, vector<128x128xf32>
    %c0_1 = arith.constant 0 : index
    %c0_2 = arith.constant 0 : index
    %1 = vector.load %arg2[%c0_1, %c0_2] : memref<1x128xf32, #tpu.memory_space<vmem>>, vector<1x128xf32>
    %2 = vector.broadcast %1 : vector<1x128xf32> to vector<128x128xf32>
    %3 = arith.mulf %0, %2 : vector<128x128xf32>
    %c0_3 = arith.constant 0 : index
    %c0_4 = arith.constant 0 : index
    %4 = vector.load %arg3[%c0_3, %c0_4] : memref<1x128xf32, #tpu.memory_space<vmem>>, vector<1x128xf32>
    %5 = vector.broadcast %4 : vector<1x128xf32> to vector<128x128xf32>
    %6 = arith.addf %3, %5 : vector<128x128xf32>
    %c0_5 = arith.constant 0 : index
    %c0_6 = arith.constant 0 : index
    %7 = vector.load %arg4[%c0_5, %c0_6] : memref<128x128xf32, #tpu.memory_space<vmem>>, vector<128x128xf32>
    %c0_7 = arith.constant 0 : index
    %c0_8 = arith.constant 0 : index
    %8 = vector.load %arg5[%c0_7, %c0_8] : memref<1x128xf32, #tpu.memory_space<vmem>>, vector<1x128xf32>
    %cst = arith.constant dense<0.000000e+00> : vector<128x128xf32>
    %9 = tpu.matmul %6, %7, %cst {dimension_numbers = #tpu.dot_dimension_numbers<[1], [0], [0], [1], [0, 0, 1, 1], [], []>} : vector<128x128xf32>, vector<128x128xf32>, vector<128x128xf32> -> vector<128x128xf32>
    %10 = vector.broadcast %8 : vector<1x128xf32> to vector<128x128xf32>
    %11 = arith.addf %9, %10 : vector<128x128xf32>
    %12 = math.tanh %11 : vector<128x128xf32>
    %c0_9 = arith.constant 0 : index
    %c0_10 = arith.constant 0 : index
    %13 = vector.load %arg6[%c0_9, %c0_10] : memref<128x128xf32, #tpu.memory_space<vmem>>, vector<128x128xf32>
    %c0_11 = arith.constant 0 : index
    %c0_12 = arith.constant 0 : index
    %14 = vector.load %arg7[%c0_11, %c0_12] : memref<1x128xf32, #tpu.memory_space<vmem>>, vector<1x128xf32>
    %cst_13 = arith.constant dense<0.000000e+00> : vector<128x128xf32>
    %15 = tpu.matmul %12, %13, %cst_13 {dimension_numbers = #tpu.dot_dimension_numbers<[1], [0], [0], [1], [0, 0, 1, 1], [], []>} : vector<128x128xf32>, vector<128x128xf32>, vector<128x128xf32> -> vector<128x128xf32>
    %16 = vector.broadcast %14 : vector<1x128xf32> to vector<128x128xf32>
    %17 = arith.addf %15, %16 : vector<128x128xf32>
    %18 = math.tanh %17 : vector<128x128xf32>
    %c0_14 = arith.constant 0 : index
    %c0_15 = arith.constant 0 : index
    %19 = vector.load %arg8[%c0_14, %c0_15] : memref<128x2xf32, #tpu.memory_space<vmem>>, vector<128x2xf32>
    %c0_16 = arith.constant 0 : index
    %c0_17 = arith.constant 0 : index
    %20 = vector.load %arg9[%c0_16, %c0_17] : memref<1x2xf32, #tpu.memory_space<vmem>>, vector<1x2xf32>
    %cst_18 = arith.constant dense<0.000000e+00> : vector<128x2xf32>
    %21 = tpu.matmul %18, %19, %cst_18 {dimension_numbers = #tpu.dot_dimension_numbers<[1], [0], [0], [1], [0, 0, 1, 1], [], []>} : vector<128x128xf32>, vector<128x2xf32>, vector<128x2xf32> -> vector<128x2xf32>
    %22 = vector.broadcast %20 : vector<1x2xf32> to vector<128x2xf32>
    %23 = arith.addf %21, %22 : vector<128x2xf32>
    %c0_19 = arith.constant 0 : index
    %c0_20 = arith.constant 0 : index
    %24 = vector.load %arg10[%c0_19, %c0_20] : memref<128x2xf32, #tpu.memory_space<vmem>>, vector<128x2xf32>
    tpu.vector_store %arg10[%c0_19, %c0_20], %23 {strides = array<i32>} : memref<128x2xf32, #tpu.memory_space<vmem>>, vector<128x2xf32>,
    return
  }
  func.func @transform_0(%arg0: i32) -> (i32, i32) {
    %c0_i32 = arith.constant 0 : i32
    %c0_i32_0 = arith.constant 0 : i32
    return %arg0, %c0_i32 : i32, i32
  }
  func.func @transform_1(%arg0: i32) -> (i32, i32) {
    %c0_i32 = arith.constant 0 : i32
    %c0_i32_0 = arith.constant 0 : i32
    %c0_i32_1 = arith.constant 0 : i32
    return %c0_i32, %c0_i32_0 : i32, i32
  }
  func.func @transform_2(%arg0: i32) -> (i32, i32) {
    %c0_i32 = arith.constant 0 : i32
    %c0_i32_0 = arith.constant 0 : i32
    %c0_i32_1 = arith.constant 0 : i32
    return %c0_i32, %c0_i32_0 : i32, i32
  }
  func.func @transform_3(%arg0: i32) -> (i32, i32) {
    %c0_i32 = arith.constant 0 : i32
    %c0_i32_0 = arith.constant 0 : i32
    %c0_i32_1 = arith.constant 0 : i32
    return %c0_i32, %c0_i32_0 : i32, i32
  }
  func.func @transform_4(%arg0: i32) -> (i32, i32) {
    %c0_i32 = arith.constant 0 : i32
    %c0_i32_0 = arith.constant 0 : i32
    %c0_i32_1 = arith.constant 0 : i32
    return %c0_i32, %c0_i32_0 : i32, i32
  }
  func.func @transform_5(%arg0: i32) -> (i32, i32) {
    %c0_i32 = arith.constant 0 : i32
    %c0_i32_0 = arith.constant 0 : i32
    %c0_i32_1 = arith.constant 0 : i32
    return %c0_i32, %c0_i32_0 : i32, i32
  }
  func.func @transform_6(%arg0: i32) -> (i32, i32) {
    %c0_i32 = arith.constant 0 : i32
    %c0_i32_0 = arith.constant 0 : i32
    %c0_i32_1 = arith.constant 0 : i32
    return %c0_i32, %c0_i32_0 : i32, i32
  }
  func.func @transform_7(%arg0: i32) -> (i32, i32) {
    %c0_i32 = arith.constant 0 : i32
    %c0_i32_0 = arith.constant 0 : i32
    %c0_i32_1 = arith.constant 0 : i32
    return %c0_i32, %c0_i32_0 : i32, i32
  }
  func.func @transform_8(%arg0: i32) -> (i32, i32) {
    %c0_i32 = arith.constant 0 : i32
    %c0_i32_0 = arith.constant 0 : i32
    %c0_i32_1 = arith.constant 0 : i32
    return %c0_i32, %c0_i32_0 : i32, i32
  }
  func.func @transform_9(%arg0: i32) -> (i32, i32) {
    %c0_i32 = arith.constant 0 : i32
    %c0_i32_0 = arith.constant 0 : i32
    return %arg0, %c0_i32 : i32, i32
  }
}

</mosaic_0001>

<bundles_post_ra>
// kernel: tpu_custom_call.1
= control target key start
LH: loop header
LB: loop body
LE: loop exit
PB: predicated region body
PF: predicated region fallthrough
CT: control target
= control target key end

     0   :  { %14 = vsyncpa [#allocation3], 0  ;;  %s2125_s0 = inlined_call_operand.hbm [shape: f32[256,128], index: 0, kind: input, shape index: {}]   ;;  %s2126_s1 = inlined_call_operand.vmem [shape: f32[1,128], index: 1, kind: input, shape index: {}]   ;;  %s2127_s2 = inlined_call_operand.vmem [shape: f32[1,128], index: 2, kind: input, shape index: {}]   ;;  %s2128_s3 = inlined_call_operand.vmem [shape: f32[128,128], index: 3, kind: input, shape index: {}]   ;;  %s2129_s4 = inlined_call_operand.vmem [shape: f32[1,128], index: 4, kind: input, shape index: {}]   ;;  %s2130_s5 = inlined_call_operand.hbm [shape: f32[128,128], index: 5, kind: input, shape index: {}]   ;;  %s2131_s6 = inlined_call_operand.vmem [shape: f32[1,128], index: 6, kind: input, shape index: {}]   ;;  %s2132_s7 = inlined_call_operand.vmem [shape: f32[128,2], index: 7, kind: input, shape index: {}]   ;;  %s2133_s8 = inlined_call_operand.vmem [shape: f32[1,2], index: 8, kind: input, shape index: {}]   ;;  %s2134_s9 = inlined_call_operand.vmem [shape: f32[256,2], index: 9, kind: output, shape index: {}]  }
   0x1   :  { %16 = vsyncpa [#allocation3 + $0x1], 0 }
   0x2   :  { %17 = vsyncpa [#allocation5], 0  ;;  %s1727_s30 = smov 0   ;;  %s1729_s10 = smov 0  }
   0x3   :  { %s1731_s11 = smov 0   ;;  %s1733_s12 = smov 0  }
   0x4 LB: > { %s2139_s13 = sadd.s32 4294967295, %s1671_s12   ;;  %p43_p0 = scmp.ne.s32.totalorder %s1663_s10, %s1659_s30  ;;  %s1671_s12 = sphi %s1733_s12, %s2152_s12   ;;  %s1667_s11 = sphi %s1731_s11, %s2151_s11   ;;  %s1663_s10 = sphi %s1729_s10, %s2150_s10   ;;  %s1659_s30 = sphi %s1727_s30, %s2149_s30  }
   0x5   : > { %p1749_p1 = scmp.eq.s32.totalorder %s2139_s13, 0  ;;  %p1064_p2 = scmp.ge.s32.totalorder %s1671_s12, 1 }
   0x6   : > { %p248_p3 = scmp.lt.s32.totalorder %s1671_s12, 3  ;;  %s1673_s17 = smov [#allocation4]  }
   0x7   : > { %s2140_s14 = scalar_select %p1749_p1, 1, 0 }
   0x8   : > { %p1757_p4 = por %p1749_p1, %p43_p0  ;;  %p1761_p5 = pnand %p1064_p2, %p248_p3 }
   0x9   : > { %s272_s18 = sshll.u32 %s1673_s17, 4  ;;  %s1774_s20 = sadd.s32 1, %s1671_s12   ;;  %s273_s18 = int_to_ptr.vmem [resolvable:$true] %s272_s18 }
   0xa   : > { %s2141_s15 = scalar_select %p1757_p4, 1, 0 }
   0xb   : > { %s2142_s16 = scalar_select %p1761_p5, 1, 0 }
   0xc   : > { %p1465_p6 = pneg %p1761_p5  ;;  %s30_s21 = sadd.s32 1, %s1667_s11 }
   0xd   : > { %s27_s22 = ssub.s32 %s1671_s12, %s1774_s20  ;;  %s1575_s25 = scalar_lea.hbm %s2130_s5, 2048 }
   0xe   : > { %p1769_p7 = pnand %p1465_p6, %p1749_p1  ;;  %p1576_p8 = scmp.ne.s32.totalorder %s2130_s5, %s1575_s25 }
   0xf   : > { %p1582_p12 = scmp.lt.u32.totalorder %s1575_s25, %s2130_s5 }
  0x10   : > { %p1577_p9 = pneg %p1769_p7 }
  0x12   : > { %p1578_p10 = pnand %p1577_p9, %p1576_p8 }
  0x14   : > { %p1579_p11 = pneg %p1578_p10 }
  0x16   : > { %p1584_p13 = pnand %p1582_p12, %p1579_p11 }
  0x18   : > { %1587 = shalt.err (!%p1584_p13)
}
  0x19   : > { %s1588_s30 = scalar_lea.vmem %s273_s18, 2048  ;;  %p1596_p6 = scmp.lt.s32.totalorder %s273_s18, %s273_s18 }
  0x1a   : > { %p1589_p0 = scmp.ne.s32.totalorder %s273_s18, %s1588_s30  ;;  %p1597_p1 = scmp.lt.s32.totalorder %s1588_s30, %s1588_s30 }
  0x1c   : > { %p1591_p2 = pnand %p1589_p0, %p1577_p9  ;;  %p1598_p4 = por %p1597_p1, %p1596_p6 }
  0x1e   : > { %p1592_p3 = pneg %p1591_p2 }
  0x20   : > { %p1599_p5 = pnand %p1598_p4, %p1592_p3 }
  0x22   : > { %1602 = shalt.err (!%p1599_p5)
}
  0x23   : > { %s1674_s17 = smov 128   ;;  %s1675_s23 = smov 8  }
  0x24   : > { %1468 = dma.hbm_to_vmem [thread:$0]  (!%p1769_p7), %s2130_s5, 2048, %s273_s18, [#allocation5], %s1674_s17, %s1674_s17, %s1675_s23  }
  0x25   : > { %p28_p1 = scmp.eq.s32.totalorder %s27_s22, 0  ;;  %p37_p4 = scmp.ne.s32.totalorder %s1667_s11, %s1663_s10 }
  0x26   : > { %p38_p5 = scmp.eq.s32.totalorder %s1671_s12, 0  ;;  %p1474_p8 = scmp.lt.s32.totalorder %s1671_s12, 2 }
  0x27   : > { %s1803_s26 = scalar_select %p28_p1, %s1667_s11, %s30_s21  }
  0x28   : > { %p39_p9 = por %p38_p5, %p37_p4  ;;  %s295_s27 = sand.u32 1, %s1667_s11  }
  0x29   : > { %s1067_s28 = sshll.u32 %s295_s27, 7  ;;  %s1082_s29 = sshll.u32 %s1671_s12, 11 }
  0x2a   : > { %s1810_s19 = scalar_lea.hbm %s2125_s0, %s1082_s29  ;;  %s299_s18 = scalar_lea.vmem [#allocation2], %s1067_s28 }
  0x2b   : > { %s306_s22 = sshll.u32 %s299_s18, 4  ;;  %p1814_p7 = pnand %p1474_p8, %p39_p9  ;;  %s1812_s22 = int_to_ptr.vmem [resolvable:$true] %s306_s22 }
  0x2c   : > { %s1818_s24 = scalar_lea.sflag [#allocation3], %s295_s27  ;;  %s1603_s25 = scalar_lea.hbm %s1810_s19, 2048 }
  0x2d   : > { %p1604_p10 = scmp.ne.s32.totalorder %s1810_s19, %s1603_s25  ;;  %p1605_p11 = pneg %p1814_p7 }
  0x2e   : > { %s1608_s29 = scalar_lea.hbm %s2125_s0, 4096  ;;  %p1609_p0 = scmp.lt.u32.totalorder %s1810_s19, %s2125_s0 }
  0x2f   : > { %p1606_p12 = pnand %p1605_p11, %p1604_p10  ;;  %p1610_p2 = scmp.lt.u32.totalorder %s1608_s29, %s1603_s25 }
  0x30   : > { %p1612_p6 = scmp.lt.u32.totalorder %s1603_s25, %s1810_s19 }
  0x31   : > { %p1607_p13 = pneg %p1606_p12  ;;  %p1611_p3 = por %p1610_p2, %p1609_p0 }
  0x33   : > { %p1613_p1 = por %p1612_p6, %p1611_p3 }
  0x35   : > { %p1614_p4 = pnand %p1613_p1, %p1607_p13 }
  0x37   : > { %1617 = shalt.err (!%p1614_p4)
}
  0x38   : > { %s1618_s27 = scalar_lea.vmem %s1812_s22, 2048  ;;  %s1676_s13 = smov [#allocation2]  }
  0x39   : > { %p1619_p5 = scmp.ne.s32.totalorder %s1812_s22, %s1618_s27  ;;  %s1623_s28 = sshll.u32 %s1676_s13, 4  ;;  %s1624_s28 = int_to_ptr.vmem [resolvable:$false] %s1623_s28 }
  0x3a   : > { %s1625_s30 = scalar_lea.vmem %s1624_s28, 4096  ;;  %p1626_p10 = scmp.lt.s32.totalorder %s1812_s22, %s1624_s28 }
  0x3b   : > { %p1621_p8 = pnand %p1619_p5, %p1605_p11  ;;  %p1627_p12 = scmp.lt.s32.totalorder %s1625_s30, %s1618_s27 }
  0x3d   : > { %p1622_p9 = pneg %p1621_p8  ;;  %p1628_p0 = por %p1627_p12, %p1626_p10 }
  0x3f   : > { %p1629_p2 = pnand %p1628_p0, %p1622_p9 }
  0x41   : > { %1632 = shalt.err (!%p1629_p2)
}
  0x42   : > { %1472 = dma.hbm_to_vmem [thread:$0]  (!%p1814_p7), %s1810_s19, 2048, %s1812_s22, %s1818_s24, %s1674_s17, %s1674_s17, %s1675_s23  }
  0x43   : > { %p2145_p11 = scmp.ne.s32.totalorder %s2142_s16, 0 }
  0x44   : > { %s320_s25 = sand.u32 (!%p2145_p11), 1, %s1663_s10   ;;  %p2146_p13 = scmp.ne.s32.totalorder (!%p2145_p11), %s2141_s15, 0 }
  0x45   : > { %318 = sbr.rel (%p2145_p11) target bundleno = 813 (0x32d), region = 56  ;;  %s1071_s29 = sshll.u32 (!%p2145_p11), %s320_s25, 7 }
  0x46   : > { %s321_s18 = scalar_lea.sflag (!%p2145_p11), [#allocation3], %s320_s25  ;;  %s1852_s27 = scalar_lea.vmem (!%p2145_p11), [#allocation2], %s1071_s29 }
  0x4c   : > { %1650 = dma.done.wait (%p2146_p13), %s321_s18, 2048  }
  0x4d   : > { %1652 = vsyncadd (%p2146_p13), %s321_s18, 4294965248  ;;  %p2147_p3 = scmp.ne.s32.totalorder %s2140_s14, 0 }
  0x4f   : > { %1654 = dma.done.wait (%p2147_p3), [#allocation5], 2048  }
  0x50   : > { %1656 = vsyncadd (%p2147_p3), [#allocation5], 4294965248  ;;  %v432_v0 = vld [vmem:[%s2128_s3] sm:$0xff]  ;;  %v433_v1 = vld [vmem:[%s2128_s3 + $0x8] sm:$0xff]  ;;  %s2148_s13 = sadd.s32 4294967295, %s1671_s12   ;;  %vm968_vm0 = vcmask 15360  }
  0x51   : > { %v434_v2 = vld [vmem:[%s2128_s3 + $0x10] sm:$0xff]  ;;  %v1347_v3 = vpack.c.bf16 %v433_v1, %v432_v0  ;;  %v435_v4 = vld [vmem:[%s2128_s3 + $0x18] sm:$0xff]  ;;  %v436_v6 = vld [vmem:[%s2128_s3 + $0x20] sm:$0xff]  ;;  %s1073_s28 = sshll.u32 %s2148_s13, 4 }
  0x52   : > { %v1351_v5 = vpack.c.bf16 %v435_v4, %v434_v2  ;;  %v437_v7 = vld [vmem:[%s2128_s3 + $0x28] sm:$0xff]  ;;  %v370_v9 = vld [vmem:[%s1852_s27] sm:$0xff]  ;;  %v438_v11 = vld [vmem:[%s2128_s3 + $0x30] sm:$0xff]  ;;  %p365_p7 = scmp.lt.s32.totalorder %s1073_s28, 31 }
  0x53   : > { %1348 = vmatprep.subr.bf16.mxu0 %v1347_v3  ;;  %v1355_v8 = vpack.c.bf16 %v437_v7, %v436_v6  ;;  %v1884_v10 = vld [vmem:[%s2126_s1] ss:$0 sm:$0xff]  ;;  %v439_v12 = vld [vmem:[%s2128_s3 + $0x38] sm:$0xff]  ;;  %v441_v18 = vld [vmem:[%s2128_s3 + $0x48] sm:$0xff] }
  0x54   : > { %1350 = vmatpush3.bf16.msra.mxu0 %v1347_v3  ;;  %v393_v13 = vmul.f32 %v1884_v10, %v370_v9  ;;  %v1896_v14 = vld [vmem:[%s2127_s2] ss:$0 sm:$0xff]  ;;  %v1359_v16 = vpack.c.bf16 %v439_v12, %v438_v11  ;;  %v617_v20 = vld [vmem:[#allocation4 + $0x8] sm:$0xff]  ;;  %v618_v21 = vld [vmem:[#allocation4 + $0x10] sm:$0xff]  ;;  %s2154_s28 = smov (!%p365_p7, %s1073_s28), 31 }
  0x55   : > { %1352 = vmatprep.subr.bf16.mxu0 %v1351_v5  ;;  %v440_v17 = vld [vmem:[%s2128_s3 + $0x40] sm:$0xff]  ;;  %v619_v22 = vld [vmem:[#allocation4 + $0x18] sm:$0xff]  ;;  %v442_v24 = vld [vmem:[%s2128_s3 + $0x50] sm:$0xff]  ;;  %s1074_s30 = sshll.u32 %s2154_s28, 3 }
  0x56   : > { %v416_v15 = vadd.f32 %v1896_v14, %v393_v13  ;;  %v616_v19 = vld [vmem:[#allocation4] sm:$0xff]  ;;  %v1363_v23 = vpack.c.bf16 %v441_v18, %v440_v17  ;;  %v443_v25 = vld [vmem:[%s2128_s3 + $0x58] sm:$0xff]  ;;  %v1383_v27 = vpack.c.bf16 %v619_v22, %v618_v21  ;;  %v621_v29 = vld [vmem:[#allocation4 + $0x28] sm:$0xff]  ;;  %s2078_s17 = scalar_lea.vmem %s2134_s9, %s1074_s30 }
  0x57   : > { %v1379_v26 = vpack.c.bf16 %v617_v20, %v616_v19  ;;  %v620_v28 = vld [vmem:[#allocation4 + $0x20] sm:$0xff]  ;;  %v1367_v30 = vpack.c.bf16 %v443_v25, %v442_v24  ;;  %v445_v32 = vld [vmem:[%s2128_s3 + $0x68] sm:$0xff]  ;;  %v622_v34 = vld [vmem:[#allocation4 + $0x30] sm:$0xff] }
  0x58   : > { %1354 = vmatpush3.bf16.msra.mxu0 %v1351_v5  ;;  %1211 = vmatprep.mubr.f32.mxu0 %v416_v15  ;;  %v444_v31 = vld [vmem:[%s2128_s3 + $0x60] sm:$0xff]  ;;  %v1387_v33 = vpack.c.bf16 %v621_v29, %v620_v28  ;;  %v623_v35 = vld [vmem:[#allocation4 + $0x38] sm:$0xff]  ;;  %v446_v37 = vld [vmem:[%s2128_s3 + $0x70] sm:$0xff] }
  0x59   : > { %1356 = vmatprep.subr.bf16.mxu0 %v1355_v8  ;;  %1380 = vmatprep.subr.bf16.mxu1 %v1379_v26  ;;  %v1371_v36 = vpack.c.bf16 %v445_v32, %v444_v31  ;;  %v447_v38 = vld [vmem:[%s2128_s3 + $0x78] sm:$0xff]  ;;  %v1391_v39 = vpack.c.bf16 %v623_v35, %v622_v34  ;;  %v371_v40 = vld [vmem:[%s1852_s27 + $0x8] sm:$0xff]  ;;  %v372_v42 = vld [vmem:[%s1852_s27 + $0x10] sm:$0xff] }
  0x5a   : > { %1382 = vmatpush3.bf16.msra.mxu1 %v1379_v26  ;;  %v1375_v41 = vpack.c.bf16 %v447_v38, %v446_v37  ;;  %v394_v43 = vmul.f32 %v1884_v10, %v371_v40  ;;  %v395_v44 = vmul.f32 %v1884_v10, %v372_v42  ;;  %v373_v45 = vld [vmem:[%s1852_s27 + $0x18] sm:$0xff]  ;;  %v374_v46 = vld [vmem:[%s1852_s27 + $0x20] sm:$0xff]  ;;  %v375_v51 = vld [vmem:[%s1852_s27 + $0x28] sm:$0xff] }
  0x5b   : > { %1384 = vmatprep.subr.bf16.mxu1 %v1383_v27  ;;  %v396_v48 = vmul.f32 %v1884_v10, %v373_v45  ;;  %v397_v50 = vmul.f32 %v1884_v10, %v374_v46  ;;  %v376_v52 = vld [vmem:[%s1852_s27 + $0x30] sm:$0xff]  ;;  %v398_v54 = vmul.f32 %v1884_v10, %v375_v51  ;;  %v377_v57 = vld [vmem:[%s1852_s27 + $0x38] sm:$0xff]  ;;  %v378_v58 = vld [vmem:[%s1852_s27 + $0x40] sm:$0xff] }
  0x5c   : > { %1358 = vmatpush3.bf16.msra.mxu0 %v1355_v8  ;;  %v417_v47 = vadd.f32 %v1896_v14, %v394_v43  ;;  %v418_v49 = vadd.f32 %v1896_v14, %v395_v44  ;;  %v399_v56 = vmul.f32 %v1884_v10, %v376_v52  ;;  %v400_v60 = vmul.f32 %v1884_v10, %v377_v57  ;;  %v379_v63 = vld [vmem:[%s1852_s27 + $0x48] sm:$0xff]  ;;  %v380_v0 = vld [vmem:[%s1852_s27 + $0x50] sm:$0xff]  ;;  %v381_v5 = vld [vmem:[%s1852_s27 + $0x58] sm:$0xff] }
  0x5d   : > { %1360 = vmatprep.subr.bf16.mxu0 %v1359_v16  ;;  %v419_v53 = vadd.f32 %v1896_v14, %v396_v48  ;;  %v420_v55 = vadd.f32 %v1896_v14, %v397_v50  ;;  %v421_v59 = vadd.f32 %v1896_v14, %v398_v54  ;;  %v401_v62 = vmul.f32 %v1884_v10, %v378_v58  ;;  %v382_v6 = vld [vmem:[%s1852_s27 + $0x60] sm:$0xff]  ;;  %v383_v12 = vld [vmem:[%s1852_s27 + $0x68] sm:$0xff]  ;;  %v384_v13 = vld [vmem:[%s1852_s27 + $0x70] sm:$0xff] }
  0x5e   : > { %1386 = vmatpush3.bf16.msra.mxu1 %v1383_v27  ;;  %v422_v61 = vadd.f32 %v1896_v14, %v399_v56  ;;  %v423_v1 = vadd.f32 %v1896_v14, %v400_v60  ;;  %v402_v2 = vmul.f32 %v1884_v10, %v379_v63  ;;  %v403_v4 = vmul.f32 %v1884_v10, %v380_v0  ;;  %v385_v19 = vld [vmem:[%s1852_s27 + $0x78] sm:$0xff]  ;;  %v624_v24 = vld [vmem:[#allocation4 + $0x40] sm:$0xff]  ;;  %v625_v25 = vld [vmem:[#allocation4 + $0x48] sm:$0xff] }
  0x5f   : > { %1388 = vmatprep.subr.bf16.mxu1 %v1387_v33  ;;  %v424_v3 = vadd.f32 %v1896_v14, %v401_v62  ;;  %v404_v8 = vmul.f32 %v1884_v10, %v381_v5  ;;  %v405_v11 = vmul.f32 %v1884_v10, %v382_v6  ;;  %v407_v18 = vmul.f32 %v1884_v10, %v384_v13  ;;  %v626_v27 = vld [vmem:[#allocation4 + $0x50] sm:$0xff]  ;;  %v627_v28 = vld [vmem:[#allocation4 + $0x58] sm:$0xff]  ;;  %v800_v34 = vld [vmem:[%s2132_s7] sm:$0xff] }
  0x60   : > { %1362 = vmatpush3.bf16.msra.mxu0 %v1359_v16  ;;  %v425_v7 = vadd.f32 %v1896_v14, %v402_v2  ;;  %v426_v9 = vadd.f32 %v1896_v14, %v403_v4  ;;  %v406_v16 = vmul.f32 %v1884_v10, %v383_v12  ;;  %v408_v21 = vmul.f32 %v1884_v10, %v385_v19  ;;  %v629_v10 = vld [vmem:[#allocation4 + $0x68] sm:$0xff]  ;;  %v630_v32 = vld [vmem:[#allocation4 + $0x70] sm:$0xff]  ;;  %v803_v38 = vld [vmem:[%s2132_s7 + $0x18] sm:$0xff] }
  0x61   : > { %1364 = vmatprep.subr.bf16.mxu0 %v1363_v23  ;;  %v427_v15 = vadd.f32 %v1896_v14, %v404_v8  ;;  %v428_v17 = vadd.f32 %v1896_v14, %v405_v11  ;;  %v430_v22 = vadd.f32 %v1896_v14, %v407_v18  ;;  %v1395_v26 = vpack.c.bf16 %v625_v25, %v624_v24  ;;  %v801_v35 = vld [vmem:[%s2132_s7 + $0x8] sm:$0xff]  ;;  %v804_v40 = vld [vmem:[%s2132_s7 + $0x20] sm:$0xff]  ;;  %v806_v43 = vld [vmem:[%s2132_s7 + $0x30] sm:$0xff] }
  0x62   : > { %1390 = vmatpush3.bf16.msra.mxu1 %v1387_v33  ;;  %v429_v20 = vadd.f32 %v1896_v14, %v406_v16  ;;  %v1399_v29 = vpack.c.bf16 %v627_v28, %v626_v27  ;;  %v631_v33 = vld [vmem:[#allocation4 + $0x78] sm:$0xff]  ;;  %v1411_v37 = vpack.c.bf16 %v801_v35, %v800_v34  ;;  %v2003_v46 = vld [vmem:[%s2129_s4] ss:$0 sm:$0xff]  ;;  %v810_v34 = vld [vmem:[%s2132_s7 + $0x50] sm:$0xff] }
  0x63   : > { %1392 = vmatprep.subr.bf16.mxu1 %v1391_v39  ;;  %v807_v44 = vld [vmem:[%s2132_s7 + $0x38] sm:$0xff] }
  0x64   : > { %1366 = vmatpush3.bf16.msra.mxu0 %v1363_v23  ;;  %v431_v23 = vadd.f32 %v1896_v14, %v408_v21  ;;  %v1407_v14 = vpack.c.bf16 %v631_v33, %v630_v32  ;;  %v1995_v45 = vpack.c.bf16 %v807_v44, %v806_v43  ;;  %v808_v32 = vld [vmem:[%s2132_s7 + $0x40] sm:$0xff]  ;;  %v809_v33 = vld [vmem:[%s2132_s7 + $0x48] sm:$0xff]  ;;  %v811_v35 = vld [vmem:[%s2132_s7 + $0x58] sm:$0xff] }
  0x65   : > { %1368 = vmatprep.subr.bf16.mxu0 %v1367_v30  ;;  %v2052_v43 = vld [vmem:[%s2131_s6] ss:$0 sm:$0xff] }
  0x66   : > { %1394 = vmatpush3.bf16.msra.mxu1 %v1391_v39 }
  0x67   : > { %1396 = vmatprep.subr.bf16.mxu1 %v1395_v26 }
  0x68   : > { %1370 = vmatpush3.bf16.msra.mxu0 %v1367_v30  ;;  %v628_v30 = vld [vmem:[#allocation4 + $0x60] sm:$0xff] }
  0x69   : > { %1372 = vmatprep.subr.bf16.mxu0 %v1371_v36  ;;  %v1403_v31 = vpack.c.bf16 %v629_v10, %v628_v30 }
  0x6a   : > { %1398 = vmatpush3.bf16.msra.mxu1 %v1395_v26 }
  0x6b   : > { %1400 = vmatprep.subr.bf16.mxu1 %v1399_v29 }
  0x6c   : > { %1374 = vmatpush3.bf16.msra.mxu0 %v1371_v36  ;;  %v802_v36 = vld [vmem:[%s2132_s7 + $0x10] sm:$0xff] }
  0x6d   : > { %1376 = vmatprep.subr.bf16.mxu0 %v1375_v41  ;;  %v1415_v39 = vpack.c.bf16 %v803_v38, %v802_v36  ;;  %v1431_v36 = vpack.c.bf16 %v811_v35, %v810_v34  ;;  %v813_v38 = vld [vmem:[%s2132_s7 + $0x68] sm:$0xff] }
  0x6e   : > { %1402 = vmatpush3.bf16.msra.mxu1 %v1399_v29 }
  0x6f   : > { %1404 = vmatprep.subr.bf16.mxu1 %v1403_v31 }
  0x70   : > { %1378 = vmatpush3.bf16.msra.mxu0 %v1375_v41  ;;  %v805_v41 = vld [vmem:[%s2132_s7 + $0x28] sm:$0xff] }
  0x71   : > { %1412 = vmatprep.subr.bf16.mxu0 %v1411_v37  ;;  %v1986_v42 = vpack.c.bf16 %v805_v41, %v804_v40  ;;  %v814_v40 = vld [vmem:[%s2132_s7 + $0x70] sm:$0xff]  ;;  %v815_v41 = vld [vmem:[%s2132_s7 + $0x78] sm:$0xff] }
  0x72   : > { %1406 = vmatpush3.bf16.msra.mxu1 %v1403_v31 }
  0x73   : > { %1212 = vmatmul.mubr.f32.vlgmr.msra.gmra.mrb[0].mxu0 %v417_v47  ;;  %1408 = vmatprep.subr.bf16.mxu1 %v1407_v14 }
  0x74   : > { %1214 = vmatprep.mubr.f32.mxu0 %v418_v49  ;;  %1414 = vmatpush3.bf16.msra.mxu0 %v1411_v37 }
  0x75   : > { %1416 = vmatprep.subr.bf16.mxu0 %v1415_v39 }
  0x76   : > { %1410 = vmatpush3.bf16.msra.mxu1 %v1407_v14  ;;  %v1427_v14 = vpack.c.bf16 %v809_v33, %v808_v32 }
  0x77   : > { %1215 = vmatmul.mubr.f32.gmra.mrb[2].mxu0 %v419_v53  ;;  %1443 = vmatprep.subr.bf16.mxu1 %v1411_v37 }
  0x78   : > { %1217 = vmatprep.mubr.f32.mxu0 %v420_v55  ;;  %1418 = vmatpush3.bf16.msra.mxu0 %v1415_v39 }
  0x79   : > { %1420 = vmatprep.subr.bf16.mxu0 %v1986_v42 }
  0x7b   : > { %1218 = vmatmul.mubr.f32.gmra.mrb[4].mxu0 %v421_v59 }
  0x7c   : > { %1220 = vmatprep.mubr.f32.mxu0 %v422_v61  ;;  %1422 = vmatpush3.bf16.msra.mxu0 %v1986_v42 }
  0x7d   : > { %1424 = vmatprep.subr.bf16.mxu0 %v1995_v45 }
  0x7f   : > { %1221 = vmatmul.mubr.f32.gmra.mrb[6].mxu0 %v423_v1 }
  0x80   : > { %1223 = vmatprep.mubr.f32.mxu0 %v424_v3  ;;  %1426 = vmatpush3.bf16.msra.mxu0 %v1995_v45 }
  0x81   : > { %1428 = vmatprep.subr.bf16.mxu0 %v1427_v14 }
  0x83   : > { %1224 = vmatmul.mubr.f32.gmra.mrb[8].mxu0 %v425_v7 }
  0x84   : > { %1226 = vmatprep.mubr.f32.mxu0 %v426_v9  ;;  %1430 = vmatpush3.bf16.msra.mxu0 %v1427_v14 }
  0x85   : > { %1432 = vmatprep.subr.bf16.mxu0 %v1431_v36 }
  0x87   : > { %1227 = vmatmul.mubr.f32.gmra.mrb[10].mxu0 %v427_v15 }
  0x88   : > { %1229 = vmatprep.mubr.f32.mxu0 %v428_v17  ;;  %1434 = vmatpush3.bf16.msra.mxu0 %v1431_v36 }
  0x8b   : > { %1230 = vmatmul.mubr.f32.gmra.mrb[12].mxu0 %v429_v20 }
  0x8c   : > { %1232 = vmatprep.mubr.f32.mxu0 %v430_v22 }
  0x8f   : > { %1233 = vmatmul.mubr.f32.gmra.mrb[14].mxu0 %v431_v23 }
 0x146   : > { %v1213_v47 = vpop.f32.mrb[0].mxu0 }
 0x147   : > { %v527_v48 = vadd.f32 %v1213_v47, %v2003_v46  ;;  %v521_v49 = vpop.f32.mrb[1].mxu0 }
 0x148   : > { %v522_v50 = vadd.f32 %v2003_v46, %v521_v49 }
 0x14a   : > { %1511 = vtanh.f32 %v522_v50  ;;  %v1216_v51 = vpop.f32.mrb[2].mxu0 }
 0x14b   : > { %1513 = vtanh.f32 %v527_v48  ;;  %v537_v52 = vadd.f32 %v1216_v51, %v2003_v46  ;;  %v531_v53 = vpop.f32.mrb[3].mxu0 }
 0x14c   : > { %v532_v54 = vadd.f32 %v2003_v46, %v531_v53 }
 0x14e   : > { %1515 = vtanh.f32 %v532_v54  ;;  %v1219_v55 = vpop.f32.mrb[4].mxu0 }
 0x14f   : > { %1517 = vtanh.f32 %v537_v52  ;;  %v547_v56 = vadd.f32 %v1219_v55, %v2003_v46  ;;  %v541_v57 = vpop.f32.mrb[5].mxu0 }
 0x150   : > { %v542_v58 = vadd.f32 %v2003_v46, %v541_v57 }
 0x152   : > { %1519 = vtanh.f32 %v542_v58  ;;  %v1222_v59 = vpop.f32.mrb[6].mxu0 }
 0x153   : > { %1521 = vtanh.f32 %v547_v56  ;;  %v557_v60 = vadd.f32 %v1222_v59, %v2003_v46  ;;  %v551_v61 = vpop.f32.mrb[7].mxu0 }
 0x154   : > { %v1512_v62 = vpop.eup %1511  ;;  %v552_v63 = vadd.f32 %v2003_v46, %v551_v61 }
 0x155   : > { %v1514_v0 = vpop.eup %1513  ;;  %1267 = vmatprep.mubr.f32.mxu1 %v1512_v62 }
 0x156   : > { %1523 = vtanh.f32 %v552_v63  ;;  %v1225_v1 = vpop.f32.mrb[8].mxu0  ;;  %1268 = vmatmul.mubr.f32.vlgmr.msra.gmra.mrb[0].mxu1 %v1514_v0 }
 0x157   : > { %1525 = vtanh.f32 %v557_v60  ;;  %v567_v2 = vadd.f32 %v1225_v1, %v2003_v46  ;;  %v561_v3 = vpop.f32.mrb[9].mxu0  ;;  %1451 = vmatpush3.bf16.msra.mxu1 %v1411_v37  ;;  %v812_v37 = vld [vmem:[%s2132_s7 + $0x60] sm:$0xff] }
 0x158   : > { %v1516_v4 = vpop.eup %1515  ;;  %v562_v5 = vadd.f32 %v2003_v46, %v561_v3  ;;  %1444 = vmatprep.subr.bf16.mxu1 %v1415_v39 }
 0x159   : > { %v1518_v6 = vpop.eup %1517  ;;  %1270 = vmatprep.mubr.f32.mxu1 %v1516_v4 }
 0x15a   : > { %1527 = vtanh.f32 %v562_v5  ;;  %v1228_v7 = vpop.f32.mrb[10].mxu0  ;;  %1271 = vmatmul.mubr.f32.gmra.mrb[2].mxu1 %v1518_v6 }
 0x15b   : > { %1529 = vtanh.f32 %v567_v2  ;;  %v577_v8 = vadd.f32 %v1228_v7, %v2003_v46  ;;  %v571_v9 = vpop.f32.mrb[11].mxu0  ;;  %1452 = vmatpush3.bf16.msra.mxu1 %v1415_v39  ;;  %v1435_v39 = vpack.c.bf16 %v813_v38, %v812_v37 }
 0x15c   : > { %v1520_v11 = vpop.eup %1519  ;;  %v572_v12 = vadd.f32 %v2003_v46, %v571_v9  ;;  %1445 = vmatprep.subr.bf16.mxu1 %v1986_v42 }
 0x15d   : > { %v1522_v13 = vpop.eup %1521  ;;  %1273 = vmatprep.mubr.f32.mxu1 %v1520_v11  ;;  %1436 = vmatprep.subr.bf16.mxu0 %v1435_v39 }
 0x15e   : > { %1531 = vtanh.f32 %v572_v12  ;;  %v1231_v15 = vpop.f32.mrb[12].mxu0  ;;  %1274 = vmatmul.mubr.f32.gmra.mrb[4].mxu1 %v1522_v13  ;;  %1438 = vmatpush3.bf16.msra.mxu0 %v1435_v39 }
 0x15f   : > { %1533 = vtanh.f32 %v577_v8  ;;  %v587_v16 = vadd.f32 %v1231_v15, %v2003_v46  ;;  %v581_v17 = vpop.f32.mrb[13].mxu0  ;;  %1453 = vmatpush3.bf16.msra.mxu1 %v1986_v42  ;;  %v1439_v42 = vpack.c.bf16 %v815_v41, %v814_v40 }
 0x160   : > { %v1524_v18 = vpop.eup %1523  ;;  %v582_v19 = vadd.f32 %v2003_v46, %v581_v17  ;;  %1446 = vmatprep.subr.bf16.mxu1 %v1995_v45 }
 0x161   : > { %v1526_v20 = vpop.eup %1525  ;;  %1276 = vmatprep.mubr.f32.mxu1 %v1524_v18  ;;  %1440 = vmatprep.subr.bf16.mxu0 %v1439_v42 }
 0x162   : > { %1535 = vtanh.f32 %v582_v19  ;;  %v1234_v21 = vpop.f32.mrb[14].mxu0  ;;  %1277 = vmatmul.mubr.f32.gmra.mrb[6].mxu1 %v1526_v20  ;;  %1442 = vmatpush3.bf16.msra.mxu0 %v1439_v42 }
 0x163   : > { %1537 = vtanh.f32 %v587_v16  ;;  %v597_v22 = vadd.f32 %v1234_v21, %v2003_v46  ;;  %v591_v23 = vpop.f32.mrb[15].mxu0  ;;  %1454 = vmatpush3.bf16.msra.mxu1 %v1995_v45 }
 0x164   : > { %v1528_v24 = vpop.eup %1527  ;;  %v592_v25 = vadd.f32 %v2003_v46, %v591_v23  ;;  %1447 = vmatprep.subr.bf16.mxu1 %v1427_v14 }
 0x165   : > { %v1530_v26 = vpop.eup %1529  ;;  %1279 = vmatprep.mubr.f32.mxu1 %v1528_v24 }
 0x166   : > { %1539 = vtanh.f32 %v592_v25  ;;  %1280 = vmatmul.mubr.f32.gmra.mrb[8].mxu1 %v1530_v26 }
 0x167   : > { %1541 = vtanh.f32 %v597_v22  ;;  %1455 = vmatpush3.bf16.msra.mxu1 %v1427_v14 }
 0x168   : > { %v1532_v27 = vpop.eup %1531  ;;  %1448 = vmatprep.subr.bf16.mxu1 %v1431_v36 }
 0x169   : > { %v1534_v28 = vpop.eup %1533  ;;  %1282 = vmatprep.mubr.f32.mxu1 %v1532_v27 }
 0x16a   : > { %1283 = vmatmul.mubr.f32.gmra.mrb[10].mxu1 %v1534_v28 }
 0x16b   : > { %1456 = vmatpush3.bf16.msra.mxu1 %v1431_v36 }
 0x16c   : > { %v1536_v29 = vpop.eup %1535  ;;  %1449 = vmatprep.subr.bf16.mxu1 %v1435_v39 }
 0x16d   : > { %v1538_v30 = vpop.eup %1537  ;;  %1285 = vmatprep.mubr.f32.mxu1 %v1536_v29 }
 0x16e   : > { %1286 = vmatmul.mubr.f32.gmra.mrb[12].mxu1 %v1538_v30  ;;  %v1079_v30 = vld [vmem:[%s2133_s8] ss:$0 sm:$0xff] }
 0x16f   : > { %1457 = vmatpush3.bf16.msra.mxu1 %v1435_v39 }
 0x170   : > { %v1540_v10 = vpop.eup %1539  ;;  %1450 = vmatprep.subr.bf16.mxu1 %v1439_v42 }
 0x171   : > { %v1542_v31 = vpop.eup %1541  ;;  %1288 = vmatprep.mubr.f32.mxu1 %v1540_v10 }
 0x172   : > { %1289 = vmatmul.mubr.f32.gmra.mrb[14].mxu1 %v1542_v31 }
 0x173   : > { %1458 = vmatpush3.bf16.msra.mxu1 %v1439_v42 }
 0x229   : > { %v1269_v44 = vpop.f32.mrb[0].mxu1 }
 0x22a   : > { %v711_v45 = vadd.f32 %v1269_v44, %v2052_v43  ;;  %v705_v46 = vpop.f32.mrb[1].mxu1 }
 0x22b   : > { %v706_v47 = vadd.f32 %v2052_v43, %v705_v46 }
 0x22d   : > { %1543 = vtanh.f32 %v706_v47  ;;  %v1272_v48 = vpop.f32.mrb[2].mxu1 }
 0x22e   : > { %1545 = vtanh.f32 %v711_v45  ;;  %v721_v49 = vadd.f32 %v1272_v48, %v2052_v43  ;;  %v715_v50 = vpop.f32.mrb[3].mxu1 }
 0x22f   : > { %v716_v51 = vadd.f32 %v2052_v43, %v715_v50 }
 0x231   : > { %1547 = vtanh.f32 %v716_v51  ;;  %v1275_v52 = vpop.f32.mrb[4].mxu1 }
 0x232   : > { %1549 = vtanh.f32 %v721_v49  ;;  %v731_v53 = vadd.f32 %v1275_v52, %v2052_v43  ;;  %v725_v54 = vpop.f32.mrb[5].mxu1 }
 0x233   : > { %v726_v55 = vadd.f32 %v2052_v43, %v725_v54 }
 0x235   : > { %1551 = vtanh.f32 %v726_v55  ;;  %v1278_v56 = vpop.f32.mrb[6].mxu1 }
 0x236   : > { %1553 = vtanh.f32 %v731_v53  ;;  %v741_v57 = vadd.f32 %v1278_v56, %v2052_v43  ;;  %v735_v58 = vpop.f32.mrb[7].mxu1 }
 0x237   : > { %v1544_v59 = vpop.eup %1543  ;;  %v736_v60 = vadd.f32 %v2052_v43, %v735_v58 }
 0x238   : > { %v1546_v61 = vpop.eup %1545  ;;  %1323 = vmatprep.mubr.f32.mxu0 %v1544_v59 }
 0x239   : > { %1555 = vtanh.f32 %v736_v60  ;;  %v1281_v62 = vpop.f32.mrb[8].mxu1  ;;  %1324 = vmatmul.mubr.f32.vlgmr.msra.gmra.mrb[16].mxu0 %v1546_v61 }
 0x23a   : > { %1557 = vtanh.f32 %v741_v57  ;;  %v751_v63 = vadd.f32 %v1281_v62, %v2052_v43  ;;  %v745_v0 = vpop.f32.mrb[9].mxu1 }
 0x23b   : > { %v1548_v1 = vpop.eup %1547  ;;  %v746_v2 = vadd.f32 %v2052_v43, %v745_v0 }
 0x23c   : > { %v1550_v3 = vpop.eup %1549  ;;  %1326 = vmatprep.mubr.f32.mxu0 %v1548_v1 }
 0x23d   : > { %1559 = vtanh.f32 %v746_v2  ;;  %v1284_v4 = vpop.f32.mrb[10].mxu1  ;;  %1327 = vmatmul.mubr.f32.gmra.mrb[18].mxu0 %v1550_v3 }
 0x23e   : > { %1561 = vtanh.f32 %v751_v63  ;;  %v761_v5 = vadd.f32 %v1284_v4, %v2052_v43  ;;  %v755_v6 = vpop.f32.mrb[11].mxu1 }
 0x23f   : > { %v1552_v7 = vpop.eup %1551  ;;  %v756_v8 = vadd.f32 %v2052_v43, %v755_v6 }
 0x240   : > { %v1554_v9 = vpop.eup %1553  ;;  %1329 = vmatprep.mubr.f32.mxu0 %v1552_v7 }
 0x241   : > { %1563 = vtanh.f32 %v756_v8  ;;  %v1287_v11 = vpop.f32.mrb[12].mxu1  ;;  %1330 = vmatmul.mubr.f32.gmra.mrb[20].mxu0 %v1554_v9 }
 0x242   : > { %1565 = vtanh.f32 %v761_v5  ;;  %v771_v12 = vadd.f32 %v1287_v11, %v2052_v43  ;;  %v765_v13 = vpop.f32.mrb[13].mxu1 }
 0x243   : > { %v1556_v15 = vpop.eup %1555  ;;  %v766_v16 = vadd.f32 %v2052_v43, %v765_v13 }
 0x244   : > { %v1558_v17 = vpop.eup %1557  ;;  %1332 = vmatprep.mubr.f32.mxu0 %v1556_v15 }
 0x245   : > { %1567 = vtanh.f32 %v766_v16  ;;  %v1290_v18 = vpop.f32.mrb[14].mxu1  ;;  %1333 = vmatmul.mubr.f32.gmra.mrb[22].mxu0 %v1558_v17 }
 0x246   : > { %1569 = vtanh.f32 %v771_v12  ;;  %v781_v19 = vadd.f32 %v1290_v18, %v2052_v43  ;;  %v775_v20 = vpop.f32.mrb[15].mxu1 }
 0x247   : > { %v1560_v21 = vpop.eup %1559  ;;  %v776_v22 = vadd.f32 %v2052_v43, %v775_v20 }
 0x248   : > { %v1562_v23 = vpop.eup %1561  ;;  %1335 = vmatprep.mubr.f32.mxu1 %v1560_v21 }
 0x249   : > { %1571 = vtanh.f32 %v776_v22  ;;  %1336 = vmatmul.mubr.f32.vlgmr.msra.gmra.mrb[16].mxu1 %v1562_v23 }
 0x24a   : > { %1573 = vtanh.f32 %v781_v19 }
 0x24b   : > { %v1564_v24 = vpop.eup %1563 }
 0x24c   : > { %v1566_v25 = vpop.eup %1565  ;;  %1338 = vmatprep.mubr.f32.mxu1 %v1564_v24 }
 0x24d   : > { %1339 = vmatmul.mubr.f32.gmra.mrb[18].mxu1 %v1566_v25 }
 0x24f   : > { %v1568_v26 = vpop.eup %1567 }
 0x250   : > { %v1570_v27 = vpop.eup %1569  ;;  %1341 = vmatprep.mubr.f32.mxu1 %v1568_v26 }
 0x251   : > { %1342 = vmatmul.mubr.f32.gmra.mrb[20].mxu1 %v1570_v27 }
 0x253   : > { %v1572_v28 = vpop.eup %1571 }
 0x254   : > { %v1574_v29 = vpop.eup %1573  ;;  %1344 = vmatprep.mubr.f32.mxu1 %v1572_v28 }
 0x255   : > { %1345 = vmatmul.mubr.f32.gmra.mrb[22].mxu1 %v1574_v29 }
 0x30c   : > { %v1325_v10 = vpop.f32.mrb[16].mxu0 }
 0x30d   : > { %v895_v31 = vadd.f32 %v1325_v10, %v1079_v30  ;;  %v889_v32 = vpop.f32.mrb[17].mxu0 }
 0x30e   : > { %v890_v33 = vadd.f32 %v1079_v30, %v889_v32 }
 0x30f   : > { %970 = vst.msk [vmem:[%s2078_s17 + $0x8] sm:$0xff] %vm968_vm0, %v895_v31 }
 0x310   : > { %969 = vst.msk [vmem:[%s2078_s17] sm:$0xff] %vm968_vm0, %v890_v33  ;;  %v1328_v14 = vpop.f32.mrb[18].mxu0 }
 0x311   : > { %v905_v34 = vadd.f32 %v1328_v14, %v1079_v30  ;;  %v899_v35 = vpop.f32.mrb[19].mxu0 }
 0x312   : > { %v900_v36 = vadd.f32 %v1079_v30, %v899_v35 }
 0x313   : > { %972 = vst.msk [vmem:[%s2078_s17 + $0x18] sm:$0xff] %vm968_vm0, %v905_v34 }
 0x314   : > { %971 = vst.msk [vmem:[%s2078_s17 + $0x10] sm:$0xff] %vm968_vm0, %v900_v36  ;;  %v1331_v37 = vpop.f32.mrb[20].mxu0 }
 0x315   : > { %v915_v38 = vadd.f32 %v1331_v37, %v1079_v30  ;;  %v909_v39 = vpop.f32.mrb[21].mxu0 }
 0x316   : > { %v910_v40 = vadd.f32 %v1079_v30, %v909_v39 }
 0x317   : > { %974 = vst.msk [vmem:[%s2078_s17 + $0x28] sm:$0xff] %vm968_vm0, %v915_v38 }
 0x318   : > { %973 = vst.msk [vmem:[%s2078_s17 + $0x20] sm:$0xff] %vm968_vm0, %v910_v40  ;;  %v1334_v41 = vpop.f32.mrb[22].mxu0 }
 0x319   : > { %v925_v42 = vadd.f32 %v1334_v41, %v1079_v30  ;;  %v919_v43 = vpop.f32.mrb[23].mxu0 }
 0x31a   : > { %v920_v44 = vadd.f32 %v1079_v30, %v919_v43 }
 0x31b   : > { %976 = vst.msk [vmem:[%s2078_s17 + $0x38] sm:$0xff] %vm968_vm0, %v925_v42 }
 0x31c   : > { %975 = vst.msk [vmem:[%s2078_s17 + $0x30] sm:$0xff] %vm968_vm0, %v920_v44  ;;  %v1337_v45 = vpop.f32.mrb[16].mxu1 }
 0x31d   : > { %v935_v46 = vadd.f32 %v1337_v45, %v1079_v30  ;;  %v929_v47 = vpop.f32.mrb[17].mxu1 }
 0x31e   : > { %v930_v48 = vadd.f32 %v1079_v30, %v929_v47 }
 0x31f   : > { %978 = vst.msk [vmem:[%s2078_s17 + $0x48] sm:$0xff] %vm968_vm0, %v935_v46 }
 0x320   : > { %977 = vst.msk [vmem:[%s2078_s17 + $0x40] sm:$0xff] %vm968_vm0, %v930_v48  ;;  %v1340_v49 = vpop.f32.mrb[18].mxu1 }
 0x321   : > { %v945_v50 = vadd.f32 %v1340_v49, %v1079_v30  ;;  %v939_v51 = vpop.f32.mrb[19].mxu1 }
 0x322   : > { %v940_v52 = vadd.f32 %v1079_v30, %v939_v51 }
 0x323   : > { %980 = vst.msk [vmem:[%s2078_s17 + $0x58] sm:$0xff] %vm968_vm0, %v945_v50 }
 0x324   : > { %979 = vst.msk [vmem:[%s2078_s17 + $0x50] sm:$0xff] %vm968_vm0, %v940_v52  ;;  %v1343_v53 = vpop.f32.mrb[20].mxu1 }
 0x325   : > { %v955_v54 = vadd.f32 %v1343_v53, %v1079_v30  ;;  %v949_v55 = vpop.f32.mrb[21].mxu1 }
 0x326   : > { %v950_v56 = vadd.f32 %v1079_v30, %v949_v55 }
 0x327   : > { %982 = vst.msk [vmem:[%s2078_s17 + $0x68] sm:$0xff] %vm968_vm0, %v955_v54 }
 0x328   : > { %981 = vst.msk [vmem:[%s2078_s17 + $0x60] sm:$0xff] %vm968_vm0, %v950_v56  ;;  %v1346_v57 = vpop.f32.mrb[22].mxu1 }
 0x329   : > { %v965_v58 = vadd.f32 %v1346_v57, %v1079_v30  ;;  %v959_v59 = vpop.f32.mrb[23].mxu1 }
 0x32a   : > { %v960_v60 = vadd.f32 %v1079_v30, %v959_v59 }
 0x32b   : > { %984 = vst.msk [vmem:[%s2078_s17 + $0x78] sm:$0xff] %vm968_vm0, %v965_v58 }
 0x32c   : > { %983 = vst.msk [vmem:[%s2078_s17 + $0x70] sm:$0xff] %vm968_vm0, %v960_v60 }
 0x32d PF: > { %p20_p6 = scmp.ge.s32.totalorder %s1774_s20, 4   ;;  %s2149_s30 = smov %s1663_s10 }
 0x32e   : > { %s2150_s10 = smov %s1667_s11  ;;  %s2151_s11 = smov %s1803_s26 }
 0x32f   : > { %s2152_s12 = smov %s1774_s20  ;;  %22 = sbr.rel (!%p20_p6) target bundleno = 4 (0x4), region = 100 }
 0x336   :  { %1007 = vsyncpa [#allocation3], 1 }
 0x337   :  { %1009 = vsyncpa [#allocation3 + $0x1], 1 }
 0x338   :  { %1010 = vsyncpa [#allocation5], 1 }

</bundles_post_ra>
